<compile_context>
chip_gen: v5e
topology: v5e:2x2
jax: 0.10.0
libtpu: 0.0.40
codegen_flags: <defaults>
</compile_context>

<pallas_src>
import jax
import jax.numpy as jnp
from jax.experimental import pallas as pl
from jax.experimental.pallas import tpu as pltpu


def _round_up(n, m):
    return ((n + m - 1) // m) * m


def _mlp4_kernel(x_ref,
                 w1_ref, b1_ref,
                 w2_ref, b2_ref,
                 w3_ref, b3_ref,
                 w4_ref, b4_ref,
                 w5_ref, b5_ref,
                 o_ref):
    def hidden_layer(h, w_ref, b_ref):
        # Linear (BN already folded into W/b on host); accumulate in f32 on MXU.
        y = jnp.dot(h.astype(w_ref.dtype), w_ref[...],
                    preferred_element_type=jnp.float32)
        y = y + b_ref[...].astype(jnp.float32)
        # ReLU (Dropout is identity in eval mode).
        return jnp.maximum(y, 0.0)

    h = x_ref[...].astype(jnp.float32)
    h = hidden_layer(h, w1_ref, b1_ref)
    h = hidden_layer(h, w2_ref, b2_ref)
    h = hidden_layer(h, w3_ref, b3_ref)
    h = hidden_layer(h, w4_ref, b4_ref)

    logits = jnp.dot(h.astype(w5_ref.dtype), w5_ref[...],
                     preferred_element_type=jnp.float32)
    logits = logits + b5_ref[...].astype(jnp.float32)

    # softmax over the feature axis (PyTorch F.softmax implicit dim=1 for 2-D).
    m = jnp.max(logits, axis=-1, keepdims=True)
    e = jnp.exp(logits - m)
    denom = jnp.sum(e, axis=-1, keepdims=True)
    # Exact reciprocal (approx=False): the ~8-bit approx vrcp broke the
    # sum-to-1 tolerance; one full-precision divide per row is negligible here.
    o_ref[...] = (e * pl.reciprocal(denom, approx=False)).astype(o_ref.dtype)


def fold_batchnorm(raw_params, eps=1e-5):
    """Fold eval-mode BatchNorm1d into the preceding Linear's weight/bias.

    raw_params holds, for layers 1..4:  w, b, gamma, beta, mean, var
    and for layer 5:                    w, b
    Returns a dict with only w1..w5, b1..b5 (BN-folded).
    """
    folded = {}
    for idx in range(1, 5):
        w = raw_params[f"w{idx}"]          # (in, out)
        b = raw_params[f"b{idx}"]          # (1, out)
        scale = raw_params[f"gamma{idx}"] / jnp.sqrt(raw_params[f"var{idx}"] + eps)
        shift = raw_params[f"beta{idx}"] - raw_params[f"mean{idx}"] * scale
        folded[f"w{idx}"] = w * scale                  # per-output-column scale
        folded[f"b{idx}"] = b * scale + shift
    folded["w5"] = raw_params["w5"]
    folded["b5"] = raw_params["b5"]
    return folded


def mlp4_forward(x, params, *, block_b=256, param_dtype=jnp.float32):
    """x: (B, input_dim) float32.  params: BN-folded dict w1..w5, b1..b5 (2-D)."""
    B, in_dim = x.shape
    hidden_dim = params["w1"].shape[1]
    out_dim = params["w5"].shape[1]

    # Batch tile: whole (8-padded) batch in one step if it fits, else block_b
    # rows per step.  Pad the batch so no divisibility assert is needed.
    block_b = min(block_b, _round_up(B, 8))
    B_pad = _round_up(B, block_b)
    if B_pad != B:
        x = jnp.pad(x, ((0, B_pad - B), (0, 0)))
    grid = (B_pad // block_b,)

    param_order = ["w1", "b1", "w2", "b2", "w3", "b3", "w4", "b4", "w5", "b5"]
    flat_params = []
    for k in param_order:
        p = params[k]
        # Optionally cast weights (not biases) to bf16 for v6e/v7x MXU / HBM BW.
        if k.startswith("w"):
            p = p.astype(param_dtype)
        flat_params.append(p)

    # x tiled over batch; every parameter is a full (un-tiled) block that stays
    # resident in VMEM across grid steps.
    in_specs = [pl.BlockSpec((block_b, in_dim), lambda i: (i, 0))]
    for p in flat_params:
        in_specs.append(pl.BlockSpec(p.shape, lambda i: (0, 0)))
    out_specs = pl.BlockSpec((block_b, out_dim), lambda i: (i, 0))

    # Advisory cost estimate for the XLA scheduler.
    matmul_flops = 2 * B_pad * (in_dim * hidden_dim
                                + 3 * hidden_dim * hidden_dim
                                + hidden_dim * out_dim)
    bytes_accessed = (x.size * x.dtype.itemsize
                      + sum(int(p.size) * p.dtype.itemsize for p in flat_params)
                      + B_pad * out_dim * 4)
    cost = pl.CostEstimate(flops=matmul_flops,
                           transcendentals=B_pad * out_dim,
                           bytes_accessed=bytes_accessed)

    out = pl.pallas_call(
        _mlp4_kernel,
        out_shape=jax.ShapeDtypeStruct((B_pad, out_dim), jnp.float32),
        grid_spec=pltpu.PrefetchScalarGridSpec(
            num_scalar_prefetch=0,
            grid=grid,
            in_specs=in_specs,
            out_specs=out_specs,
        ),
        compiler_params=pltpu.CompilerParams(
            dimension_semantics=("parallel",),
        ),
        cost_estimate=cost,
    )(x, *flat_params)

    return out[:B] if B_pad != B else out


def init_params(key, input_dim, output_dim, hidden_dim):
    """Deterministic synthetic init mirroring _4layers.__init__ (raw, un-folded)."""
    dims = [(input_dim, hidden_dim),
            (hidden_dim, hidden_dim),
            (hidden_dim, hidden_dim),
            (hidden_dim, hidden_dim),
            (hidden_dim, output_dim)]
    params = {}
    keys = jax.random.split(key, 2 * len(dims))
    for idx, (fan_in, fan_out) in enumerate(dims, start=1):
        bound = 1.0 / jnp.sqrt(jnp.asarray(fan_in, jnp.float32))
        params[f"w{idx}"] = jax.random.uniform(
            keys[2 * idx - 2], (fan_in, fan_out), jnp.float32, -bound, bound)
        params[f"b{idx}"] = jax.random.uniform(
            keys[2 * idx - 1], (1, fan_out), jnp.float32, -bound, bound)
    # BatchNorm1d defaults: gamma=1, beta=0, running_mean=0, running_var=1.
    for idx in range(1, 5):
        params[f"gamma{idx}"] = jnp.ones((1, hidden_dim), jnp.float32)
        params[f"beta{idx}"] = jnp.zeros((1, hidden_dim), jnp.float32)
        params[f"mean{idx}"] = jnp.zeros((1, hidden_dim), jnp.float32)
        params[f"var{idx}"] = jnp.ones((1, hidden_dim), jnp.float32)
    return params


def _reference_forward(x, raw_params, eps=1e-5):
    """Plain-JAX reference with explicit (un-folded) eval-mode BatchNorm."""
    h = x
    for idx in range(1, 5):
        h = h @ raw_params[f"w{idx}"] + raw_params[f"b{idx}"]
        scale = raw_params[f"gamma{idx}"] / jnp.sqrt(raw_params[f"var{idx}"] + eps)
        h = (h - raw_params[f"mean{idx}"]) * scale + raw_params[f"beta{idx}"]
        h = jnp.maximum(h, 0.0)
    logits = h @ raw_params["w5"] + raw_params["b5"]
    return jax.nn.softmax(logits, axis=-1)


if __name__ == "__main__":
    INPUT_DIM = 16
    OUTPUT_DIM = 8
    HIDDEN_DIM = 32
    BATCH = 16

    key = jax.random.PRNGKey(0)
    k_x, k_p = jax.random.split(key)
    x = jax.random.normal(k_x, (BATCH, INPUT_DIM), jnp.float32)
    raw_params = init_params(k_p, INPUT_DIM, OUTPUT_DIM, HIDDEN_DIM)
    params = fold_batchnorm(raw_params)

    out = mlp4_forward(x, params)
    out = jax.block_until_ready(out)

    ref = _reference_forward(x, raw_params)
    assert out.shape == (BATCH, OUTPUT_DIM)
    # exact-reciprocal softmax: rows sum to 1 within f32 rounding
    assert jnp.allclose(jnp.sum(out, axis=-1), 1.0, atol=1e-5)
    assert jnp.allclose(out, ref, atol=1e-5, rtol=1e-4)

    print("KERNEL_OK")
</pallas_src>

<mosaic_0001>
module attributes {stable_mosaic.version = 11 : i64} {
  func.func @_mlp4_kernel(%arg0: i32, %arg1: memref<16x16xf32, #tpu.memory_space<vmem>>, %arg2: memref<16x32xf32, #tpu.memory_space<vmem>>, %arg3: memref<1x32xf32, #tpu.memory_space<vmem>>, %arg4: memref<32x32xf32, #tpu.memory_space<vmem>>, %arg5: memref<1x32xf32, #tpu.memory_space<vmem>>, %arg6: memref<32x32xf32, #tpu.memory_space<vmem>>, %arg7: memref<1x32xf32, #tpu.memory_space<vmem>>, %arg8: memref<32x32xf32, #tpu.memory_space<vmem>>, %arg9: memref<1x32xf32, #tpu.memory_space<vmem>>, %arg10: memref<32x8xf32, #tpu.memory_space<vmem>>, %arg11: memref<1x8xf32, #tpu.memory_space<vmem>>, %arg12: memref<16x8xf32, #tpu.memory_space<vmem>>) attributes {dimension_semantics = [#tpu.dimension_semantics<parallel>], iteration_bounds = array<i64: 1>, scalar_prefetch = 0 : i64, scratch_operands = 0 : i64, tpu.core_type = #tpu.core_type<tc>, window_params = [{transform_indices = @transform_0, window_bounds = array<i64: 16, 16>}, {pipeline_mode = #tpu.pipeline_mode<synchronous>, transform_indices = @transform_1, window_bounds = array<i64: 16, 32>}, {pipeline_mode = #tpu.pipeline_mode<synchronous>, transform_indices = @transform_2, window_bounds = array<i64: 1, 32>}, {pipeline_mode = #tpu.pipeline_mode<synchronous>, transform_indices = @transform_3, window_bounds = array<i64: 32, 32>}, {pipeline_mode = #tpu.pipeline_mode<synchronous>, transform_indices = @transform_4, window_bounds = array<i64: 1, 32>}, {pipeline_mode = #tpu.pipeline_mode<synchronous>, transform_indices = @transform_5, window_bounds = array<i64: 32, 32>}, {pipeline_mode = #tpu.pipeline_mode<synchronous>, transform_indices = @transform_6, window_bounds = array<i64: 1, 32>}, {pipeline_mode = #tpu.pipeline_mode<synchronous>, transform_indices = @transform_7, window_bounds = array<i64: 32, 32>}, {pipeline_mode = #tpu.pipeline_mode<synchronous>, transform_indices = @transform_8, window_bounds = array<i64: 1, 32>}, {pipeline_mode = #tpu.pipeline_mode<synchronous>, transform_indices = @transform_9, window_bounds = array<i64: 32, 8>}, {pipeline_mode = #tpu.pipeline_mode<synchronous>, transform_indices = @transform_10, window_bounds = array<i64: 1, 8>}, {transform_indices = @transform_11, window_bounds = array<i64: 16, 8>}]} {
    %c0 = arith.constant 0 : index
    %c0_0 = arith.constant 0 : index
    %0 = vector.load %arg1[%c0, %c0_0] : memref<16x16xf32, #tpu.memory_space<vmem>>, vector<16x16xf32>
    %c0_1 = arith.constant 0 : index
    %c0_2 = arith.constant 0 : index
    %1 = vector.load %arg2[%c0_1, %c0_2] : memref<16x32xf32, #tpu.memory_space<vmem>>, vector<16x32xf32>
    %cst = arith.constant dense<0.000000e+00> : vector<16x32xf32>
    %2 = tpu.matmul %0, %1, %cst {dimension_numbers = #tpu.dot_dimension_numbers<[1], [0], [0], [1], [0, 0, 1, 1], [], []>} : vector<16x16xf32>, vector<16x32xf32>, vector<16x32xf32> -> vector<16x32xf32>
    %c0_3 = arith.constant 0 : index
    %c0_4 = arith.constant 0 : index
    %3 = vector.load %arg3[%c0_3, %c0_4] : memref<1x32xf32, #tpu.memory_space<vmem>>, vector<1x32xf32>
    %4 = vector.broadcast %3 : vector<1x32xf32> to vector<16x32xf32>
    %5 = arith.addf %2, %4 : vector<16x32xf32>
    %cst_5 = arith.constant 0.000000e+00 : f32
    %6 = vector.broadcast %cst_5 : f32 to vector<16x32xf32>
    %7 = arith.maximumf %5, %6 : vector<16x32xf32>
    %c0_6 = arith.constant 0 : index
    %c0_7 = arith.constant 0 : index
    %8 = vector.load %arg4[%c0_6, %c0_7] : memref<32x32xf32, #tpu.memory_space<vmem>>, vector<32x32xf32>
    %cst_8 = arith.constant dense<0.000000e+00> : vector<16x32xf32>
    %9 = tpu.matmul %7, %8, %cst_8 {dimension_numbers = #tpu.dot_dimension_numbers<[1], [0], [0], [1], [0, 0, 1, 1], [], []>} : vector<16x32xf32>, vector<32x32xf32>, vector<16x32xf32> -> vector<16x32xf32>
    %c0_9 = arith.constant 0 : index
    %c0_10 = arith.constant 0 : index
    %10 = vector.load %arg5[%c0_9, %c0_10] : memref<1x32xf32, #tpu.memory_space<vmem>>, vector<1x32xf32>
    %11 = vector.broadcast %10 : vector<1x32xf32> to vector<16x32xf32>
    %12 = arith.addf %9, %11 : vector<16x32xf32>
    %cst_11 = arith.constant 0.000000e+00 : f32
    %13 = vector.broadcast %cst_11 : f32 to vector<16x32xf32>
    %14 = arith.maximumf %12, %13 : vector<16x32xf32>
    %c0_12 = arith.constant 0 : index
    %c0_13 = arith.constant 0 : index
    %15 = vector.load %arg6[%c0_12, %c0_13] : memref<32x32xf32, #tpu.memory_space<vmem>>, vector<32x32xf32>
    %cst_14 = arith.constant dense<0.000000e+00> : vector<16x32xf32>
    %16 = tpu.matmul %14, %15, %cst_14 {dimension_numbers = #tpu.dot_dimension_numbers<[1], [0], [0], [1], [0, 0, 1, 1], [], []>} : vector<16x32xf32>, vector<32x32xf32>, vector<16x32xf32> -> vector<16x32xf32>
    %c0_15 = arith.constant 0 : index
    %c0_16 = arith.constant 0 : index
    %17 = vector.load %arg7[%c0_15, %c0_16] : memref<1x32xf32, #tpu.memory_space<vmem>>, vector<1x32xf32>
    %18 = vector.broadcast %17 : vector<1x32xf32> to vector<16x32xf32>
    %19 = arith.addf %16, %18 : vector<16x32xf32>
    %cst_17 = arith.constant 0.000000e+00 : f32
    %20 = vector.broadcast %cst_17 : f32 to vector<16x32xf32>
    %21 = arith.maximumf %19, %20 : vector<16x32xf32>
    %c0_18 = arith.constant 0 : index
    %c0_19 = arith.constant 0 : index
    %22 = vector.load %arg8[%c0_18, %c0_19] : memref<32x32xf32, #tpu.memory_space<vmem>>, vector<32x32xf32>
    %cst_20 = arith.constant dense<0.000000e+00> : vector<16x32xf32>
    %23 = tpu.matmul %21, %22, %cst_20 {dimension_numbers = #tpu.dot_dimension_numbers<[1], [0], [0], [1], [0, 0, 1, 1], [], []>} : vector<16x32xf32>, vector<32x32xf32>, vector<16x32xf32> -> vector<16x32xf32>
    %c0_21 = arith.constant 0 : index
    %c0_22 = arith.constant 0 : index
    %24 = vector.load %arg9[%c0_21, %c0_22] : memref<1x32xf32, #tpu.memory_space<vmem>>, vector<1x32xf32>
    %25 = vector.broadcast %24 : vector<1x32xf32> to vector<16x32xf32>
    %26 = arith.addf %23, %25 : vector<16x32xf32>
    %cst_23 = arith.constant 0.000000e+00 : f32
    %27 = vector.broadcast %cst_23 : f32 to vector<16x32xf32>
    %28 = arith.maximumf %26, %27 : vector<16x32xf32>
    %c0_24 = arith.constant 0 : index
    %c0_25 = arith.constant 0 : index
    %29 = vector.load %arg10[%c0_24, %c0_25] : memref<32x8xf32, #tpu.memory_space<vmem>>, vector<32x8xf32>
    %cst_26 = arith.constant dense<0.000000e+00> : vector<16x8xf32>
    %30 = tpu.matmul %28, %29, %cst_26 {dimension_numbers = #tpu.dot_dimension_numbers<[1], [0], [0], [1], [0, 0, 1, 1], [], []>} : vector<16x32xf32>, vector<32x8xf32>, vector<16x8xf32> -> vector<16x8xf32>
    %c0_27 = arith.constant 0 : index
    %c0_28 = arith.constant 0 : index
    %31 = vector.load %arg11[%c0_27, %c0_28] : memref<1x8xf32, #tpu.memory_space<vmem>>, vector<1x8xf32>
    %32 = vector.broadcast %31 : vector<1x8xf32> to vector<16x8xf32>
    %33 = arith.addf %30, %32 : vector<16x8xf32>
    %cst_29 = arith.constant dense<0xFF800000> : vector<16xf32>
    %34 = vector.multi_reduction <maximumf>, %33, %cst_29 [1] : vector<16x8xf32> to vector<16xf32>
    %35 = vector.shape_cast %34 : vector<16xf32> to vector<16x1xf32>
    %36 = vector.broadcast %35 : vector<16x1xf32> to vector<16x8xf32>
    %37 = arith.subf %33, %36 : vector<16x8xf32>
    %38 = math.exp %37 : vector<16x8xf32>
    %cst_30 = arith.constant dense<0.000000e+00> : vector<16xf32>
    %39 = vector.multi_reduction <add>, %38, %cst_30 [1] : vector<16x8xf32> to vector<16xf32>
    %40 = vector.shape_cast %39 : vector<16xf32> to vector<16x1xf32>
    %41 = tpu.reciprocal %40 : vector<16x1xf32> -> vector<16x1xf32>
    %42 = vector.broadcast %41 : vector<16x1xf32> to vector<16x8xf32>
    %43 = arith.mulf %38, %42 : vector<16x8xf32>
    %c0_31 = arith.constant 0 : index
    %c0_32 = arith.constant 0 : index
    %44 = vector.load %arg12[%c0_31, %c0_32] : memref<16x8xf32, #tpu.memory_space<vmem>>, vector<16x8xf32>
    tpu.vector_store %arg12[%c0_31, %c0_32], %43 {strides = array<i32>} : memref<16x8xf32, #tpu.memory_space<vmem>>, vector<16x8xf32>,
    return
  }
  func.func @transform_0(%arg0: i32) -> (i32, i32) {
    %c0_i32 = arith.constant 0 : i32
    %c0_i32_0 = arith.constant 0 : i32
    return %arg0, %c0_i32 : i32, i32
  }
  func.func @transform_1(%arg0: i32) -> (i32, i32) {
    %c0_i32 = arith.constant 0 : i32
    %c0_i32_0 = arith.constant 0 : i32
    %c0_i32_1 = arith.constant 0 : i32
    return %c0_i32, %c0_i32_0 : i32, i32
  }
  func.func @transform_2(%arg0: i32) -> (i32, i32) {
    %c0_i32 = arith.constant 0 : i32
    %c0_i32_0 = arith.constant 0 : i32
    %c0_i32_1 = arith.constant 0 : i32
    return %c0_i32, %c0_i32_0 : i32, i32
  }
  func.func @transform_3(%arg0: i32) -> (i32, i32) {
    %c0_i32 = arith.constant 0 : i32
    %c0_i32_0 = arith.constant 0 : i32
    %c0_i32_1 = arith.constant 0 : i32
    return %c0_i32, %c0_i32_0 : i32, i32
  }
  func.func @transform_4(%arg0: i32) -> (i32, i32) {
    %c0_i32 = arith.constant 0 : i32
    %c0_i32_0 = arith.constant 0 : i32
    %c0_i32_1 = arith.constant 0 : i32
    return %c0_i32, %c0_i32_0 : i32, i32
  }
  func.func @transform_5(%arg0: i32) -> (i32, i32) {
    %c0_i32 = arith.constant 0 : i32
    %c0_i32_0 = arith.constant 0 : i32
    %c0_i32_1 = arith.constant 0 : i32
    return %c0_i32, %c0_i32_0 : i32, i32
  }
  func.func @transform_6(%arg0: i32) -> (i32, i32) {
    %c0_i32 = arith.constant 0 : i32
    %c0_i32_0 = arith.constant 0 : i32
    %c0_i32_1 = arith.constant 0 : i32
    return %c0_i32, %c0_i32_0 : i32, i32
  }
  func.func @transform_7(%arg0: i32) -> (i32, i32) {
    %c0_i32 = arith.constant 0 : i32
    %c0_i32_0 = arith.constant 0 : i32
    %c0_i32_1 = arith.constant 0 : i32
    return %c0_i32, %c0_i32_0 : i32, i32
  }
  func.func @transform_8(%arg0: i32) -> (i32, i32) {
    %c0_i32 = arith.constant 0 : i32
    %c0_i32_0 = arith.constant 0 : i32
    %c0_i32_1 = arith.constant 0 : i32
    return %c0_i32, %c0_i32_0 : i32, i32
  }
  func.func @transform_9(%arg0: i32) -> (i32, i32) {
    %c0_i32 = arith.constant 0 : i32
    %c0_i32_0 = arith.constant 0 : i32
    %c0_i32_1 = arith.constant 0 : i32
    return %c0_i32, %c0_i32_0 : i32, i32
  }
  func.func @transform_10(%arg0: i32) -> (i32, i32) {
    %c0_i32 = arith.constant 0 : i32
    %c0_i32_0 = arith.constant 0 : i32
    %c0_i32_1 = arith.constant 0 : i32
    return %c0_i32, %c0_i32_0 : i32, i32
  }
  func.func @transform_11(%arg0: i32) -> (i32, i32) {
    %c0_i32 = arith.constant 0 : i32
    %c0_i32_0 = arith.constant 0 : i32
    return %arg0, %c0_i32 : i32, i32
  }
}

</mosaic_0001>

<bundles_post_ra>
// kernel: tpu_custom_call.1
= control target key start
LH: loop header
LB: loop body
LE: loop exit
PB: predicated region body
PF: predicated region fallthrough
CT: control target
= control target key end

     0   :  { %16 = vsyncpa [#allocation3], 0  ;;  %s624_s0 = inlined_call_operand.hbm [shape: f32[16,16], index: 0, kind: input, shape index: {}]   ;;  %s625_s1 = inlined_call_operand.hbm [shape: f32[16,32], index: 1, kind: input, shape index: {}]   ;;  %s626_s2 = inlined_call_operand.vmem [shape: f32[1,32], index: 2, kind: input, shape index: {}]   ;;  %s627_s3 = inlined_call_operand.vmem [shape: f32[32,32], index: 3, kind: input, shape index: {}]   ;;  %s628_s4 = inlined_call_operand.vmem [shape: f32[1,32], index: 4, kind: input, shape index: {}]   ;;  %s629_s5 = inlined_call_operand.hbm [shape: f32[32,32], index: 5, kind: input, shape index: {}]   ;;  %s630_s6 = inlined_call_operand.vmem [shape: f32[1,32], index: 6, kind: input, shape index: {}]   ;;  %s631_s7 = inlined_call_operand.hbm [shape: f32[32,32], index: 7, kind: input, shape index: {}]   ;;  %s632_s8 = inlined_call_operand.vmem [shape: f32[1,32], index: 8, kind: input, shape index: {}]   ;;  %s633_s9 = inlined_call_operand.vmem [shape: f32[32,8], index: 9, kind: input, shape index: {}]   ;;  %s634_s10 = inlined_call_operand.vmem [shape: f32[1,8], index: 10, kind: input, shape index: {}]   ;;  %s635_s11 = inlined_call_operand.vmem [shape: f32[16,8], index: 11, kind: output, shape index: {}]  }
   0x1   :  { %17 = vsyncpa [#allocation5], 0 }
   0x2   :  { %18 = vsyncpa [#allocation8], 0  ;;  %s36_s19 = sshll.u32 %s625_s1, 4  ;;  %s487_s20 = smov [#allocation4]   ;;  %s37_s19 = int_to_ptr.hbm [resolvable:$true] %s36_s19 }
   0x3   :  { %s38_s21 = sshll.u32 %s487_s20, 4  ;;  %s23_s24 = sshll.u32 %s624_s0, 4  ;;  %s39_s21 = int_to_ptr.vmem [resolvable:$true] %s38_s21  ;;  %s24_s24 = int_to_ptr.hbm [resolvable:$true] %s23_s24 }
   0x4   :  { %s488_s25 = smov 128   ;;  %s489_s26 = smov 8  }
   0x5   :  { %44 = dma.hbm_to_vmem [thread:$0]  %s37_s19, 256, %s39_s21, [#allocation5], %s488_s25, %s488_s25, %s489_s26  }
   0x6   :  { %s490_s27 = smov [#allocation2]   ;;  %s55_s12 = sshll.u32 %s629_s5, 4  ;;  %s56_s12 = int_to_ptr.hbm [resolvable:$true] %s55_s12 }
   0x7   :  { %s25_s28 = sshll.u32 %s490_s27, 4  ;;  %s70_s14 = sshll.u32 %s631_s7, 4  ;;  %s26_s28 = int_to_ptr.vmem [resolvable:$true] %s25_s28  ;;  %s71_s14 = int_to_ptr.hbm [resolvable:$true] %s70_s14 }
   0x8   :  { %31 = dma.hbm_to_vmem [thread:$0]  %s24_s24, 256, %s26_s28, [#allocation3], %s488_s25, %s488_s25, %s489_s26  }
   0x9   :  { %s491_s15 = smov [#allocation6]   ;;  %s492_s0 = smov [#allocation7]  }
   0xa   :  { %s57_s16 = sshll.u32 %s491_s15, 4  ;;  %s72_s17 = sshll.u32 %s492_s0, 4  ;;  %s58_s16 = int_to_ptr.vmem [resolvable:$true] %s57_s16  ;;  %s73_s17 = int_to_ptr.vmem [resolvable:$true] %s72_s17 }
   0xb   :  { %63 = dma.hbm_to_vmem [thread:$0]  %s56_s12, 512, %s58_s16, [#allocation5], %s488_s25, %s488_s25, %s489_s26  }
   0xc   :  { %78 = dma.hbm_to_vmem [thread:$0]  %s71_s14, 512, %s73_s17, [#allocation8], %s488_s25, %s488_s25, %s489_s26  }
   0xd   :  { %481 = dma.done.wait [#allocation3], 256  }
   0xe   :  { %482 = vsyncadd [#allocation3], 4294967040 }
   0xf   :  { %483 = dma.done.wait [#allocation5], 768  }
  0x10   :  { %484 = vsyncadd [#allocation5], 4294966528 }
  0x11   :  { %485 = dma.done.wait [#allocation8], 512  }
  0x12   :  { %486 = vsyncadd [#allocation8], 4294966784  ;;  %v104_v0 = vld [vmem:[#allocation4 + $0x8] sm:$0xff]  ;;  %v103_v1 = vld [vmem:[#allocation4] sm:$0xff]  ;;  %vm109_vm0 = vcmask 130048   ;;  %vm149_vm1 = vcmask 261120  }
  0x13   :  { %130 = vmatpush.msra.mxu0 %v104_v0  ;;  %v101_v2 = vld [vmem:[#allocation2] sm:$0xff]  ;;  %364 = vmatpush.msra.mxu1 %v104_v0  ;;  %v102_v3 = vld [vmem:[#allocation2 + $0x8] sm:$0xff]  ;;  %v144_v4 = vld [vmem:[%s627_s3 + $0x18] sm:$0xff]  ;;  %vm296_vm2 = vcmask 64512  }
  0x14   :  { %v143_v5 = vld [vmem:[%s627_s3 + $0x10] sm:$0xff]  ;;  %v142_v6 = vld [vmem:[%s627_s3 + $0x8] sm:$0xff]  ;;  %v141_v7 = vld [vmem:[%s627_s3] sm:$0xff] }
  0x15   :  { %131 = vmatpush.msra.mxu0 %v103_v1  ;;  %365 = vmatpush.msra.mxu1 %v103_v1  ;;  %v184_v8 = vld [vmem:[#allocation6 + $0x18] sm:$0xff]  ;;  %v372_v9 = vld [vmem:[%s626_s2] ss:$0 sm:$0xff]  ;;  %v183_v16 = vld [vmem:[#allocation6 + $0x10] sm:$0xff] }
  0x16   :  { %354 = vmatmul.msk.f32.vlgmr.msra.gmra.mxu0 %vm109_vm0, %v101_v2  ;;  %355 = vmatmul.msk.f32.vlgmr.msra.gmra.mxu1 %vm109_vm0, %v102_v3  ;;  %v182_v17 = vld [vmem:[#allocation6 + $0x8] sm:$0xff]  ;;  %v181_v18 = vld [vmem:[#allocation6] sm:$0xff]  ;;  %v223_v19 = vld [vmem:[#allocation7 + $0x18] sm:$0xff] }
  0x17   :  { %168 = vmatpush.msrb.mxu1 %v144_v4  ;;  %207 = vmatpush.msra.mxu2 %v184_v8  ;;  %v373_v20 = vld [vmem:[%s628_s4] ss:$0 sm:$0xff]  ;;  %v222_v27 = vld [vmem:[#allocation7 + $0x10] sm:$0xff]  ;;  %v221_v28 = vld [vmem:[#allocation7 + $0x8] sm:$0xff] }
  0x18   :  { %246 = vmatpush.msra.mxu3 %v223_v19  ;;  %v220_v29 = vld [vmem:[#allocation7] sm:$0xff]  ;;  %v262_v30 = vld [vmem:[%s633_s9 + $0x18] sm:$0xff]  ;;  %v261_v31 = vld [vmem:[%s633_s9 + $0x10] sm:$0xff] }
  0x19   :  { %169 = vmatpush.msrb.mxu1 %v143_v5  ;;  %208 = vmatpush.msra.mxu2 %v183_v16  ;;  %v374_v32 = vld [vmem:[%s630_s6] ss:$0 sm:$0xff]  ;;  %v260_v39 = vld [vmem:[%s633_s9 + $0x8] sm:$0xff] }
  0x1a   :  { %247 = vmatpush.msra.mxu3 %v222_v27  ;;  %285 = vmatpush.msrb.mxu0 %v262_v30  ;;  %v259_v40 = vld [vmem:[%s633_s9] sm:$0xff] }
  0x1b   :  { %170 = vmatpush.msrb.mxu1 %v142_v6  ;;  %209 = vmatpush.msra.mxu2 %v182_v17  ;;  %v375_v41 = vld [vmem:[%s632_s8] ss:$0 sm:$0xff] }
  0x1c   :  { %248 = vmatpush.msra.mxu3 %v221_v28  ;;  %286 = vmatpush.msrb.mxu0 %v261_v31  ;;  %v376_v48 = vld [vmem:[%s634_s10] ss:$0 sm:$0xff] }
  0x1d   :  { %171 = vmatpush.msrb.mxu1 %v141_v7  ;;  %210 = vmatpush.msra.mxu2 %v181_v18 }
  0x1e   :  { %249 = vmatpush.msra.mxu3 %v220_v29  ;;  %287 = vmatpush.msrb.mxu0 %v260_v39 }
  0x20   :  { %288 = vmatpush.msrb.mxu0 %v259_v40 }
  0x93   :  { %v133_v10 = vpop.f32.mrf.mxu0  ;;  %v136_v12 = vpop.f32.mrf.mxu1 }
  0x94   :  { %v134_v11 = vadd.f32 %v372_v9, %v133_v10  ;;  %v137_v14 = vadd.f32 %v372_v9, %v136_v12 }
  0x96   :  { %v139_v13 = vmax.f32 %v134_v11, 0.0  ;;  %v140_v15 = vmax.f32 %v137_v14, 0.0 }
  0x98   :  { %356 = vmatmul.msk.f32.vlgmr.msrb.gmra.mxu1 %vm149_vm1, %v139_v13 }
  0xa0   :  { %357 = vmatmul.msk.f32.gmra.mxu1 %vm149_vm1, %v140_v15 }
 0x115   :  { %v173_v21 = vpop.f32.mrf.mxu1 }
 0x116   :  { %v174_v22 = vadd.f32 %v373_v20, %v173_v21 }
 0x118   :  { %v179_v23 = vmax.f32 %v174_v22, 0.0 }
 0x11a   :  { %358 = vmatmul.msk.f32.vlgmr.msra.gmra.mxu2 %vm149_vm1, %v179_v23 }
 0x11d   :  { %v176_v24 = vpop.f32.mrf.mxu1 }
 0x11e   :  { %v177_v25 = vadd.f32 %v373_v20, %v176_v24 }
 0x120   :  { %v180_v26 = vmax.f32 %v177_v25, 0.0 }
 0x122   :  { %359 = vmatmul.msk.f32.gmra.mxu2 %vm149_vm1, %v180_v26 }
 0x19d   :  { %v212_v33 = vpop.f32.mrf.mxu2 }
 0x19e   :  { %v213_v34 = vadd.f32 %v374_v32, %v212_v33 }
 0x1a0   :  { %v218_v35 = vmax.f32 %v213_v34, 0.0 }
 0x1a2   :  { %360 = vmatmul.msk.f32.vlgmr.msra.gmra.mxu3 %vm149_vm1, %v218_v35 }
 0x1a5   :  { %v215_v36 = vpop.f32.mrf.mxu2 }
 0x1a6   :  { %v216_v37 = vadd.f32 %v374_v32, %v215_v36 }
 0x1a8   :  { %v219_v38 = vmax.f32 %v216_v37, 0.0 }
 0x1aa   :  { %361 = vmatmul.msk.f32.gmra.mxu3 %vm149_vm1, %v219_v38 }
 0x225   :  { %v251_v42 = vpop.f32.mrf.mxu3 }
 0x226   :  { %v252_v43 = vadd.f32 %v375_v41, %v251_v42 }
 0x228   :  { %v257_v44 = vmax.f32 %v252_v43, 0.0 }
 0x22a   :  { %362 = vmatmul.msk.f32.vlgmr.msrb.gmra.mxu0 %vm149_vm1, %v257_v44 }
 0x22d   :  { %v254_v45 = vpop.f32.mrf.mxu3 }
 0x22e   :  { %v255_v46 = vadd.f32 %v375_v41, %v254_v45 }
 0x230   :  { %v258_v47 = vmax.f32 %v255_v46, 0.0 }
 0x232   :  { %363 = vmatmul.msk.f32.gmra.mxu0 %vm149_vm1, %v258_v47 }
 0x2a7   :  { %v290_v49 = vpop.f32.mrf.mxu0 }
 0x2a8   :  { %v291_v50 = vadd.f32 %v376_v48, %v290_v49 }
 0x2aa   :  { %v297_v51 = vsel %vm296_vm2, %v291_v50, -inf }
 0x2ab   :  { %298 = vmax.xlane.f32.xlu0 %v297_v51 }
 0x2af   :  { %v293_v52 = vpop.f32.mrf.mxu0 }
 0x2b0   :  { %v294_v53 = vadd.f32 %v376_v48, %v293_v52 }
 0x2b2   :  { %v300_v54 = vsel %vm296_vm2, %v294_v53, -inf }
 0x2b3   :  { %301 = vmax.xlane.f32.xlu0 %v300_v54 }
 0x31e   :  { %v299_v55 = vpop.xlane.xlu0 %298 }
 0x31f   :  { %v303_v56 = vsub.f32 %v291_v50, %v299_v55 }
 0x321   :  { %v305_v57 = vmul.f32 1.442695, %v303_v56 }
 0x323   :  { %377 = vpow2.f32 %v305_v57 }
 0x326   :  { %v302_v58 = vpop.xlane.xlu0 %301 }
 0x327   :  { %v304_v59 = vsub.f32 %v294_v53, %v302_v58 }
 0x329   :  { %v378_v60 = vpop.eup %377  ;;  %v307_v61 = vmul.f32 1.442695, %v304_v59 }
 0x32a   :  { %v309_v62 = vsel %vm296_vm2, %v378_v60, 0.0 }
 0x32b   :  { %379 = vpow2.f32 %v307_v61  ;;  %310 = vadd.xlane.f32.xlu1 %v309_v62 }
 0x331   :  { %v380_v63 = vpop.eup %379 }
 0x332   :  { %v312_v0 = vsel %vm296_vm2, %v380_v63, 0.0 }
 0x333   :  { %313 = vadd.xlane.f32.xlu1 %v312_v0 }
 0x39e   :  { %v311_v1 = vpop.xlane.xlu1 %310 }
 0x39f   :  { %381 = vrcp.f32 %v311_v1  ;;  %v326_v6 = vand.u32 2147483648, %v311_v1  ;;  %v324_v8 = vand.u32 2147483647, %v311_v1  ;;  %vm320_vm4 = vweird.f32 %v311_v1 }
 0x3a1   :  { %v327_v11 = vor.u32 1.1754944e-38, %v326_v6  ;;  %vm325_vm6 = vcmp.eq.f32.partialorder %v324_v8, 8.507059e+37 }
 0x3a5   :  { %v382_v2 = vpop.eup %381 }
 0x3a6   :  { %v316_v3 = vmul.f32 %v382_v2, %v311_v1  ;;  %v314_v4 = vpop.xlane.xlu1 %313  ;;  %vm321_vm3 = vweird.f32 %v382_v2 }
 0x3a7   :  { %383 = vrcp.f32 %v314_v4  ;;  %vm322_vm5 = vmor %vm320_vm4, %vm321_vm3  ;;  %v340_v17 = vand.u32 2147483648, %v314_v4  ;;  %v338_v19 = vand.u32 2147483647, %v314_v4  ;;  %vm334_vm8 = vweird.f32 %v314_v4 }
 0x3a8   :  { %v317_v5 = vsub.f32 1.0, %v316_v3 }
 0x3a9   :  { %v341_v21 = vor.u32 1.1754944e-38, %v340_v17  ;;  %vm339_vm10 = vcmp.eq.f32.partialorder %v338_v19, 8.507059e+37 }
 0x3aa   :  { %v318_v7 = vmul.f32 %v382_v2, %v317_v5 }
 0x3ac   :  { %v319_v9 = vadd.f32 %v382_v2, %v318_v7 }
 0x3ad   :  { %v384_v10 = vpop.eup %383 }
 0x3ae   :  { %v323_v12 = vsel %vm322_vm5, %v382_v2, %v319_v9  ;;  %v330_v13 = vmul.f32 %v384_v10, %v314_v4  ;;  %vm335_vm7 = vweird.f32 %v384_v10 }
 0x3af   :  { %v328_v14 = vsel %vm325_vm6, %v327_v11, %v323_v12  ;;  %vm336_vm9 = vmor %vm334_vm8, %vm335_vm7 }
 0x3b0   :  { %v343_v15 = vmul.f32 %v378_v60, %v328_v14  ;;  %v331_v16 = vsub.f32 1.0, %v330_v13 }
 0x3b2   :  { %345 = vst.msk [vmem:[%s635_s11] sm:$0xff] %vm296_vm2, %v343_v15  ;;  %v332_v18 = vmul.f32 %v384_v10, %v331_v16 }
 0x3b4   :  { %v333_v20 = vadd.f32 %v384_v10, %v332_v18 }
 0x3b6   :  { %v337_v22 = vsel %vm336_vm9, %v384_v10, %v333_v20 }
 0x3b7   :  { %v342_v23 = vsel %vm339_vm10, %v341_v21, %v337_v22 }
 0x3b8   :  { %v344_v24 = vmul.f32 %v380_v63, %v342_v23 }
 0x3ba   :  { %346 = vst.msk [vmem:[%s635_s11 + $0x8] sm:$0xff] %vm296_vm2, %v344_v24 }
 0x3bb   :  { %351 = vsyncpa [#allocation3], 1 }
 0x3bc   :  { %352 = vsyncpa [#allocation5], 1 }
 0x3bd   :  { %353 = vsyncpa [#allocation8], 1 }

</bundles_post_ra>
